<compile_context>
chip_gen: v5e
topology: v5e:2x2
jax: 0.10.0
libtpu: 0.0.40
codegen_flags: <defaults>
</compile_context>

<pallas_src>
import functools

import jax
import jax.numpy as jnp
from jax.experimental import pallas as pl
from jax.experimental.pallas import tpu as pltpu

NUM_BRANCHES = 5  # Conv2d(channels, 5, 1) -> always 5 fusion weights


def _sublane_multiple(dtype):
    """Dtype-aware sublane packing multiple: 8 f32, 16 bf16, 32 int8/fp8."""
    return max(8, 32 // jnp.dtype(dtype).itemsize)


def _pick_dim_tile(dim, mult, max_elems):
    """Block size along one dim: full dim when small, otherwise the largest
    multiple of `mult` that is <= min(dim, max_elems).  Grids use pl.cdiv, so
    the tile need not divide `dim` (Pallas pads edge blocks)."""
    if dim <= mult:
        return dim
    cap = min(dim, max(int(max_elems), mult))
    return max(mult, (cap // mult) * mult)


def _vmem_capacity_bytes():
    try:
        return int(pltpu.get_tpu_info().vmem_capacity_bytes)
    except Exception:  # query unavailable -> be conservative (v7x per-TC VMEM)
        return 64 * 1024 * 1024


# ---------------------------------------------------------------------------
# Stage 1: fusion-weight generation.
#   grid = (C_tiles, S_tiles) over features[0] (both reduction axes).
#   pool_acc (B, c1) accumulates the spatial sum of the current channel tile;
#   logit_acc (B, 5) accumulates the partial C->5 matmul; the last step adds
#   the bias and applies softmax.  Padded lanes/rows are masked to zero.
# ---------------------------------------------------------------------------
def _weight_gen_kernel(f0_ref, w_ref, b_ref, wts_ref, pool_acc, logit_acc, *,
                       total_c, total_s, inv_s, mask_c, mask_s):
    ci = pl.program_id(0)
    si = pl.program_id(1)
    nc = pl.num_programs(0)
    ns = pl.num_programs(1)

    @pl.when(jnp.logical_and(ci == 0, si == 0))
    def _():
        logit_acc[...] = jnp.zeros_like(logit_acc)

    @pl.when(si == 0)
    def _():
        pool_acc[...] = jnp.zeros_like(pool_acc)

    x = f0_ref[...].astype(jnp.float32)                     # (B, c1, s1)
    if mask_s:  # static: only needed when S % s1 != 0 (edge lanes are garbage)
        s_ids = jax.lax.broadcasted_iota(jnp.int32, x.shape, 2) + si * x.shape[2]
        x = jnp.where(s_ids < total_s, x, 0.0)
    pool_acc[...] += jnp.sum(x, axis=-1)                    # (B, c1)

    @pl.when(si == ns - 1)
    def _():
        pooled = pool_acc[...] * inv_s                      # mean over spatial
        if mask_c:  # static: only when C % c1 != 0 (edge rows are garbage)
            c_ids = (jax.lax.broadcasted_iota(jnp.int32, pooled.shape, 1)
                     + ci * pooled.shape[1])
            pooled = jnp.where(c_ids < total_c, pooled, 0.0)
        # conv weight passed pre-transposed (and zero-padded) as (C_pad, 5).
        logit_acc[...] += jnp.dot(pooled, w_ref[...],
                                  preferred_element_type=jnp.float32)

    @pl.when(jnp.logical_and(ci == nc - 1, si == ns - 1))
    def _():
        logits = logit_acc[...] + b_ref[...]                # (B, 5)
        m = jnp.max(logits, axis=1, keepdims=True)
        e = jnp.exp(logits - m)
        wts_ref[...] = (e / jnp.sum(e, axis=1, keepdims=True)).astype(wts_ref.dtype)


# ---------------------------------------------------------------------------
# Stage 2: streaming weighted sum over the 5 branches.
#   grid = (B, C_tiles, S_tiles), all "parallel" (disjoint output tiles).
#   wts_ref is the full (B, 5) table in SMEM -> scalar reads wts_ref[b, i].
# ---------------------------------------------------------------------------
def _fusion_kernel(wts_ref, f0_ref, f1_ref, f2_ref, f3_ref, f4_ref, out_ref):
    b = pl.program_id(0)
    acc = f0_ref[...] * wts_ref[b, 0]          # init with i=0 term (no zeros+add)
    acc = acc + f1_ref[...] * wts_ref[b, 1]
    acc = acc + f2_ref[...] * wts_ref[b, 2]
    acc = acc + f3_ref[...] * wts_ref[b, 3]
    acc = acc + f4_ref[...] * wts_ref[b, 4]
    out_ref[...] = acc.astype(out_ref.dtype)


def dynamic_weight_fusion(features, conv_w, conv_b):
    """features: list of 5 arrays (B, C, H, W); conv_w: (5, C, 1, 1); conv_b: (5,)."""
    assert len(features) == NUM_BRANCHES
    B, C, H, W = features[0].shape
    S = H * W
    out_dtype = features[0].dtype
    itemsize = jnp.dtype(out_dtype).itemsize
    sub_m = _sublane_multiple(out_dtype)

    # Flatten spatial dims (free reshape, keeps lanes spatially dense).
    feats = [f.reshape(B, C, S) for f in features]

    # ---- per-generation VMEM budget -----------------------------------------
    vmem_cap = _vmem_capacity_bytes()
    vmem_limit = min(int(vmem_cap * 0.8), 112 * 1024 * 1024)
    # Stage 2: 6 HBM streams x 2 buffers + slack for compiler-internal scratch.
    block_budget = max(512 * 1024, min(4 * 1024 * 1024, vmem_limit // 14))

    # ---- Stage 1: fusion weights (B, 5) -------------------------------------
    s1_budget = min(2 * 1024 * 1024, block_budget)   # keep Stage-1 blocks streaming-sized
    s1 = _pick_dim_tile(S, 128, max(128, s1_budget // max(B * sub_m * itemsize, 1)))
    c1 = _pick_dim_tile(C, sub_m, max(sub_m, s1_budget // max(B * s1 * itemsize, 1)))
    nc1, ns1 = pl.cdiv(C, c1), pl.cdiv(S, s1)

    # Zero-pad the (C, 5) weight to whole channel tiles: its blocks never read OOB.
    w_t = conv_w.reshape(NUM_BRANCHES, C).T.astype(jnp.float32)        # (C, 5)
    c_pad = nc1 * c1
    if c_pad != C:
        w_t = jnp.pad(w_t, ((0, c_pad - C), (0, 0)))
    b2d = conv_b.reshape(1, NUM_BRANCHES).astype(jnp.float32)          # (1, 5)

    wts = pl.pallas_call(
        functools.partial(
            _weight_gen_kernel,
            total_c=C, total_s=S, inv_s=1.0 / S,
            mask_c=(C % c1 != 0), mask_s=(S % s1 != 0)),
        out_shape=jax.ShapeDtypeStruct((B, NUM_BRANCHES), jnp.float32),
        grid=(nc1, ns1),
        in_specs=[
            pl.BlockSpec((B, c1, s1), lambda ci, si: (0, ci, si)),
            pl.BlockSpec((c1, NUM_BRANCHES), lambda ci, si: (ci, 0)),
            pl.BlockSpec((1, NUM_BRANCHES), lambda ci, si: (0, 0)),
        ],
        out_specs=pl.BlockSpec((B, NUM_BRANCHES), lambda ci, si: (0, 0)),
        scratch_shapes=[pltpu.VMEM((B, c1), jnp.float32),
                        pltpu.VMEM((B, NUM_BRANCHES), jnp.float32)],
        compiler_params=pltpu.CompilerParams(
            dimension_semantics=("arbitrary", "arbitrary"),
            vmem_limit_bytes=vmem_limit),
        cost_estimate=pl.CostEstimate(
            flops=B * C * S + 10 * B * C + 20 * B,
            transcendentals=NUM_BRANCHES * B,
            bytes_accessed=B * C * S * itemsize
                           + (c_pad + 1 + B) * NUM_BRANCHES * 4),
    )(feats[0], w_t, b2d)

    # ---- Stage 2: tiled, pipelined weighted sum (HBM-bandwidth bound) -------
    s_blk = _pick_dim_tile(S, 128, min(4096, block_budget // (sub_m * itemsize)))
    c_blk = _pick_dim_tile(C, sub_m, max(sub_m, block_budget // (s_blk * itemsize)))
    grid = (B, pl.cdiv(C, c_blk), pl.cdiv(S, s_blk))
    feat_spec = pl.BlockSpec((1, c_blk, s_blk), lambda b, ci, si: (b, ci, si))

    out = pl.pallas_call(
        _fusion_kernel,
        out_shape=jax.ShapeDtypeStruct((B, C, S), out_dtype),
        grid=grid,
        in_specs=[pl.BlockSpec(memory_space=pltpu.MemorySpace.SMEM)]  # (B, 5) weights
                 + [feat_spec] * NUM_BRANCHES,
        out_specs=pl.BlockSpec((1, c_blk, s_blk), lambda b, ci, si: (b, ci, si)),
        compiler_params=pltpu.CompilerParams(
            dimension_semantics=("parallel", "parallel", "parallel"),
            vmem_limit_bytes=vmem_limit),
        cost_estimate=pl.CostEstimate(
            flops=(2 * NUM_BRANCHES - 1) * B * C * S,
            transcendentals=0,
            bytes_accessed=(NUM_BRANCHES + 1) * B * C * S * itemsize
                           + B * NUM_BRANCHES * 4),
    )(wts, *feats)
    return out.reshape(B, C, H, W)


def _reference(features, conv_w, conv_b):
    """Pure-JAX reference (intended semantics) for correctness checking."""
    pooled = jnp.mean(features[0], axis=(2, 3))                       # (B, C)
    logits = pooled @ conv_w.reshape(NUM_BRANCHES, -1).T + conv_b     # (B, 5)
    wts = jax.nn.softmax(logits, axis=1)                              # (B, 5)
    concat = jnp.stack(features, axis=1)                              # (B, 5, C, H, W)
    return jnp.sum(concat * wts[:, :, None, None, None], axis=1)      # (B, C, H, W)


if __name__ == "__main__":
    key = jax.random.PRNGKey(0)
    B, C, H, W = 2, 4, 16, 16

    keys = jax.random.split(key, NUM_BRANCHES + 2)
    features = [jax.random.normal(keys[i], (B, C, H, W), dtype=jnp.float32)
                for i in range(NUM_BRANCHES)]
    conv_w = 0.1 * jax.random.normal(keys[NUM_BRANCHES], (NUM_BRANCHES, C, 1, 1),
                                     dtype=jnp.float32)
    conv_b = 0.1 * jax.random.normal(keys[NUM_BRANCHES + 1], (NUM_BRANCHES,),
                                     dtype=jnp.float32)

    out = dynamic_weight_fusion(features, conv_w, conv_b)
    out = jax.block_until_ready(out)

    ref = jax.block_until_ready(_reference(features, conv_w, conv_b))
    assert out.shape == (B, C, H, W)
    assert jnp.allclose(out, ref, atol=1e-5, rtol=1e-5), "mismatch vs reference"

    print("KERNEL_OK")
</pallas_src>

<mosaic_0001>
module attributes {stable_mosaic.version = 11 : i64} {
  func.func @_weight_gen_kernel(%arg0: i32, %arg1: i32, %arg2: memref<2x4x256xf32, #tpu.memory_space<vmem>>, %arg3: memref<4x5xf32, #tpu.memory_space<vmem>>, %arg4: memref<1x5xf32, #tpu.memory_space<vmem>>, %arg5: memref<2x5xf32, #tpu.memory_space<vmem>>, %arg6: memref<2x4xf32, #tpu.memory_space<vmem>>, %arg7: memref<2x5xf32, #tpu.memory_space<vmem>>) attributes {dimension_semantics = [#tpu.dimension_semantics<arbitrary>, #tpu.dimension_semantics<arbitrary>], iteration_bounds = array<i64: 1, 1>, scalar_prefetch = 0 : i64, scratch_operands = 2 : i64, tpu.core_type = #tpu.core_type<tc>, window_params = [{transform_indices = @transform_0, window_bounds = array<i64: 2, 4, 256>}, {transform_indices = @transform_1, window_bounds = array<i64: 4, 5>}, {pipeline_mode = #tpu.pipeline_mode<synchronous>, transform_indices = @transform_2, window_bounds = array<i64: 1, 5>}, {pipeline_mode = #tpu.pipeline_mode<synchronous>, transform_indices = @transform_3, window_bounds = array<i64: 2, 5>}]} {
    %c0_i32 = arith.constant 0 : i32
    %0 = arith.cmpi eq, %arg0, %c0_i32 : i32
    %c0_i32_0 = arith.constant 0 : i32
    %1 = arith.cmpi eq, %arg1, %c0_i32_0 : i32
    %2 = arith.andi %0, %1 : i1
    %3 = arith.extui %2 : i1 to i32
    %c0_i32_1 = arith.constant 0 : i32
    %4 = arith.cmpi ne, %3, %c0_i32_1 : i32
    scf.if %4 {
      %cst_15 = arith.constant 0.000000e+00 : f32
      %21 = vector.broadcast %cst_15 : f32 to vector<2x5xf32>
      %c0_16 = arith.constant 0 : index
      %c0_17 = arith.constant 0 : index
      %22 = vector.load %arg7[%c0_16, %c0_17] : memref<2x5xf32, #tpu.memory_space<vmem>>, vector<2x5xf32>
      tpu.vector_store %arg7[%c0_16, %c0_17], %21 {strides = array<i32>} : memref<2x5xf32, #tpu.memory_space<vmem>>, vector<2x5xf32>,
    } else {
    }
    %c0_i32_2 = arith.constant 0 : i32
    %5 = arith.cmpi eq, %arg1, %c0_i32_2 : i32
    %6 = arith.extui %5 : i1 to i32
    %c0_i32_3 = arith.constant 0 : i32
    %7 = arith.cmpi ne, %6, %c0_i32_3 : i32
    scf.if %7 {
      %cst_15 = arith.constant 0.000000e+00 : f32
      %21 = vector.broadcast %cst_15 : f32 to vector<2x4xf32>
      %c0_16 = arith.constant 0 : index
      %c0_17 = arith.constant 0 : index
      %22 = vector.load %arg6[%c0_16, %c0_17] : memref<2x4xf32, #tpu.memory_space<vmem>>, vector<2x4xf32>
      tpu.vector_store %arg6[%c0_16, %c0_17], %21 {strides = array<i32>} : memref<2x4xf32, #tpu.memory_space<vmem>>, vector<2x4xf32>,
    } else {
    }
    %c0 = arith.constant 0 : index
    %c0_4 = arith.constant 0 : index
    %c0_5 = arith.constant 0 : index
    %8 = vector.load %arg2[%c0, %c0_4, %c0_5] : memref<2x4x256xf32, #tpu.memory_space<vmem>>, vector<2x4x256xf32>
    %c0_6 = arith.constant 0 : index
    %c0_7 = arith.constant 0 : index
    %9 = vector.load %arg6[%c0_6, %c0_7] : memref<2x4xf32, #tpu.memory_space<vmem>>, vector<2x4xf32>
    %cst = arith.constant dense<0.000000e+00> : vector<2x4xf32>
    %10 = vector.multi_reduction <add>, %8, %cst [2] : vector<2x4x256xf32> to vector<2x4xf32>
    %11 = arith.addf %9, %10 : vector<2x4xf32>
    %c0_8 = arith.constant 0 : index
    %c0_9 = arith.constant 0 : index
    %12 = vector.load %arg6[%c0_8, %c0_9] : memref<2x4xf32, #tpu.memory_space<vmem>>, vector<2x4xf32>
    tpu.vector_store %arg6[%c0_8, %c0_9], %11 {strides = array<i32>} : memref<2x4xf32, #tpu.memory_space<vmem>>, vector<2x4xf32>,
    %c0_i32_10 = arith.constant 0 : i32
    %13 = arith.cmpi eq, %arg1, %c0_i32_10 : i32
    %14 = arith.extui %13 : i1 to i32
    %c0_i32_11 = arith.constant 0 : i32
    %15 = arith.cmpi ne, %14, %c0_i32_11 : i32
    scf.if %15 {
      %c0_15 = arith.constant 0 : index
      %c0_16 = arith.constant 0 : index
      %21 = vector.load %arg6[%c0_15, %c0_16] : memref<2x4xf32, #tpu.memory_space<vmem>>, vector<2x4xf32>
      %cst_17 = arith.constant 3.906250e-03 : f32
      %22 = vector.broadcast %cst_17 : f32 to vector<2x4xf32>
      %23 = arith.mulf %21, %22 : vector<2x4xf32>
      %c0_18 = arith.constant 0 : index
      %c0_19 = arith.constant 0 : index
      %24 = vector.load %arg7[%c0_18, %c0_19] : memref<2x5xf32, #tpu.memory_space<vmem>>, vector<2x5xf32>
      %c0_20 = arith.constant 0 : index
      %c0_21 = arith.constant 0 : index
      %25 = vector.load %arg3[%c0_20, %c0_21] : memref<4x5xf32, #tpu.memory_space<vmem>>, vector<4x5xf32>
      %cst_22 = arith.constant dense<0.000000e+00> : vector<2x5xf32>
      %26 = tpu.matmul %23, %25, %cst_22 {dimension_numbers = #tpu.dot_dimension_numbers<[1], [0], [0], [1], [0, 0, 1, 1], [], []>} : vector<2x4xf32>, vector<4x5xf32>, vector<2x5xf32> -> vector<2x5xf32>
      %27 = arith.addf %24, %26 : vector<2x5xf32>
      %c0_23 = arith.constant 0 : index
      %c0_24 = arith.constant 0 : index
      %28 = vector.load %arg7[%c0_23, %c0_24] : memref<2x5xf32, #tpu.memory_space<vmem>>, vector<2x5xf32>
      tpu.vector_store %arg7[%c0_23, %c0_24], %27 {strides = array<i32>} : memref<2x5xf32, #tpu.memory_space<vmem>>, vector<2x5xf32>,
    } else {
    }
    %c0_i32_12 = arith.constant 0 : i32
    %16 = arith.cmpi eq, %arg0, %c0_i32_12 : i32
    %c0_i32_13 = arith.constant 0 : i32
    %17 = arith.cmpi eq, %arg1, %c0_i32_13 : i32
    %18 = arith.andi %16, %17 : i1
    %19 = arith.extui %18 : i1 to i32
    %c0_i32_14 = arith.constant 0 : i32
    %20 = arith.cmpi ne, %19, %c0_i32_14 : i32
    scf.if %20 {
      %c0_15 = arith.constant 0 : index
      %c0_16 = arith.constant 0 : index
      %21 = vector.load %arg7[%c0_15, %c0_16] : memref<2x5xf32, #tpu.memory_space<vmem>>, vector<2x5xf32>
      %c0_17 = arith.constant 0 : index
      %c0_18 = arith.constant 0 : index
      %22 = vector.load %arg4[%c0_17, %c0_18] : memref<1x5xf32, #tpu.memory_space<vmem>>, vector<1x5xf32>
      %23 = vector.broadcast %22 : vector<1x5xf32> to vector<2x5xf32>
      %24 = arith.addf %21, %23 : vector<2x5xf32>
      %cst_19 = arith.constant dense<0xFF800000> : vector<2xf32>
      %25 = vector.multi_reduction <maximumf>, %24, %cst_19 [1] : vector<2x5xf32> to vector<2xf32>
      %26 = vector.shape_cast %25 : vector<2xf32> to vector<2x1xf32>
      %27 = vector.broadcast %26 : vector<2x1xf32> to vector<2x5xf32>
      %28 = arith.subf %24, %27 : vector<2x5xf32>
      %29 = math.exp %28 : vector<2x5xf32>
      %cst_20 = arith.constant dense<0.000000e+00> : vector<2xf32>
      %30 = vector.multi_reduction <add>, %29, %cst_20 [1] : vector<2x5xf32> to vector<2xf32>
      %31 = vector.shape_cast %30 : vector<2xf32> to vector<2x1xf32>
      %32 = vector.broadcast %31 : vector<2x1xf32> to vector<2x5xf32>
      %33 = arith.divf %29, %32 : vector<2x5xf32>
      %c0_21 = arith.constant 0 : index
      %c0_22 = arith.constant 0 : index
      %34 = vector.load %arg5[%c0_21, %c0_22] : memref<2x5xf32, #tpu.memory_space<vmem>>, vector<2x5xf32>
      tpu.vector_store %arg5[%c0_21, %c0_22], %33 {strides = array<i32>} : memref<2x5xf32, #tpu.memory_space<vmem>>, vector<2x5xf32>,
    } else {
    }
    return
  }
  func.func @transform_0(%arg0: i32, %arg1: i32) -> (i32, i32, i32) {
    %c0_i32 = arith.constant 0 : i32
    %c0_i32_0 = arith.constant 0 : i32
    return %c0_i32, %arg0, %arg1 : i32, i32, i32
  }
  func.func @transform_1(%arg0: i32, %arg1: i32) -> (i32, i32) {
    %c0_i32 = arith.constant 0 : i32
    %c0_i32_0 = arith.constant 0 : i32
    return %arg0, %c0_i32 : i32, i32
  }
  func.func @transform_2(%arg0: i32, %arg1: i32) -> (i32, i32) {
    %c0_i32 = arith.constant 0 : i32
    %c0_i32_0 = arith.constant 0 : i32
    %c0_i32_1 = arith.constant 0 : i32
    return %c0_i32, %c0_i32_0 : i32, i32
  }
  func.func @transform_3(%arg0: i32, %arg1: i32) -> (i32, i32) {
    %c0_i32 = arith.constant 0 : i32
    %c0_i32_0 = arith.constant 0 : i32
    %c0_i32_1 = arith.constant 0 : i32
    return %c0_i32, %c0_i32_0 : i32, i32
  }
}

</mosaic_0001>

<bundles_post_ra>
// kernel: tpu_custom_call.1
= control target key start
LH: loop header
LB: loop body
LE: loop exit
PB: predicated region body
PF: predicated region fallthrough
CT: control target
= control target key end

     0   :  { %8 = vsyncpa [#allocation5], 0  ;;  %s327_s0 = inlined_call_operand.hbm [shape: f32[2,4,256], index: 0, kind: input, shape index: {}]   ;;  %s328_s1 = inlined_call_operand.hbm [shape: f32[4,5], index: 1, kind: input, shape index: {}]   ;;  %s329_s2 = inlined_call_operand.vmem [shape: f32[1,5], index: 2, kind: input, shape index: {}]   ;;  %s330_s3 = inlined_call_operand.hbm [shape: f32[2,5], index: 3, kind: output, shape index: {}]  }
   0x1   :  { %9 = vsyncpa [#allocation8], 0 }
   0x2   :  { %10 = vsyncpa [#allocation6], 0  ;;  %s15_s14 = sshll.u32 %s327_s0, 4  ;;  %s277_s15 = smov [#allocation4]   ;;  %s16_s14 = int_to_ptr.hbm [resolvable:$true] %s15_s14 }
   0x3   :  { %s17_s16 = sshll.u32 %s277_s15, 4  ;;  %s29_s19 = sshll.u32 %s328_s1, 4  ;;  %s18_s16 = int_to_ptr.vmem [resolvable:$true] %s17_s16  ;;  %s30_s19 = int_to_ptr.hbm [resolvable:$true] %s29_s19 }
   0x4   :  { %s278_s20 = smov 128   ;;  %s279_s21 = smov 8  }
   0x5   :  { %23 = dma.hbm_to_vmem [thread:$0]  %s16_s14, 256, %s18_s16, [#allocation5], %s278_s20, %s278_s20, %s279_s21  }
   0x6   :  { %s280_s22 = smov [#allocation7]  }
   0x7   :  { %s31_s23 = sshll.u32 %s280_s22, 4  ;;  %s32_s23 = int_to_ptr.vmem [resolvable:$true] %s31_s23 }
   0x8   :  { %34 = dma.hbm_to_vmem [thread:$0]  %s30_s19, 64, %s32_s23, [#allocation8]  }
   0x9   :  { %271 = dma.done.wait [#allocation5], 256  }
   0xa   :  { %272 = vsyncadd [#allocation5], 4294967040 }
   0xb   :  { %273 = dma.done.wait [#allocation8], 64  }
   0xc   :  { %274 = vsyncadd [#allocation8], 4294967232  ;;  %v58_v0 = vld [vmem:[#allocation4] sm:$0xff]  ;;  %v59_v1 = vld [vmem:[#allocation4 + $0x8] sm:$0xff]  ;;  %vm74_vm0 = vcmask 1043456   ;;  %vm56_vm1 = vcmask 25600   ;;  %v87_v15 = vlaneseq }
   0xd   :  { %63 = vst [vmem:[#allocation1] ss:$2 sm:$0xff] %v58_v0  ;;  %v281_v12 = vmov 0.0   ;;  %v103_v13 = vld [vmem:[#allocation7] sm:$0xf]  ;;  %vm51_vm2 = vcmask 33792  }
   0xe   :  { %67 = vst [vmem:[#allocation1 + $0x10] ss:$2 sm:$0xff] %v59_v1  ;;  %186 = vmatpush.msk.msra.mxu0 %vm74_vm0, %v103_v13  ;;  %v88_v16 = vand.u32 127, %v87_v15  ;;  %vm91_vm3 = vcmask 1041409   ;;  %vm104_vm4 = vcmask 31744   ;;  %s175_s27 = sshll.u32 %s330_s3, 4  ;;  %s176_s27 = int_to_ptr.hbm [resolvable:$true] %s175_s27 }
   0xf   :  { %57 = vst.msk [vmem:[#allocation2] sm:$0x3] %vm56_vm1, %v281_v12  ;;  %v194_v28 = vld [vmem:[%s329_s2] ss:$0 sm:$0xff]  ;;  %s282_s2 = smov [#allocation9]  }
  0x10   :  { %52 = vst.msk [vmem:[#allocation3] sm:$0x3] %vm51_vm2, %v281_v12  ;;  %s173_s24 = sshll.u32 %s282_s2, 4  ;;  %s174_s24 = int_to_ptr.vmem [resolvable:$true] %s173_s24 }
  0x14   :  { %v64_v2 = vld.sshfl [vmem:[#allocation1] sm:$0xff pattern:$0x75316420]  ;;  %v65_v3 = vld.sshfl [vmem:[#allocation1 + $0x8] sm:$0xff pattern:$0x75316420] }
  0x15   :  { %v75_v4 = vsel %vm74_vm0, %v64_v2, 0.0  ;;  %v76_v5 = vsel %vm74_vm0, %v65_v3, 0.0  ;;  %v68_v7 = vld.sshfl [vmem:[#allocation1 + $0x10] sm:$0xff pattern:$0x75316420] }
  0x16   :  { %v77_v6 = vadd.f32 %v76_v5, %v75_v4  ;;  %v69_v8 = vld.sshfl [vmem:[#allocation1 + $0x18] sm:$0xff pattern:$0x75316420]  ;;  %v80_v9 = vsel %vm74_vm0, %v68_v7, 0.0  ;;  %v60_v19 = vld [vmem:[#allocation2] sm:$0x3] }
  0x17   :  { %v81_v10 = vsel %vm74_vm0, %v69_v8, 0.0  ;;  %v102_v25 = vld [vmem:[#allocation3] sm:$0x3] }
  0x18   :  { %78 = vadd.xlane.f32.xlu0 %v77_v6  ;;  %v82_v11 = vadd.f32 %v81_v10, %v80_v9 }
  0x20   :  { %83 = vadd.xlane.f32.xlu0 %v82_v11 }
  0x8b   :  { %v79_v14 = vpop.xlane.xlu0 %78 }
  0x8c   :  { %v89_v18 = vperm.slane %v79_v14, %v88_v16 }
  0x93   :  { %v84_v17 = vpop.xlane.xlu0 %83 }
  0x94   :  { %v90_v20 = vperm.slane %v84_v17, %v88_v16 }
  0x96   :  { %v92_v21 = vsel %vm91_vm3, %v90_v20, %v89_v18 }
  0x97   :  { %v94_v22 = vadd.f32 %v92_v21, %v60_v19 }
  0x99   :  { %96 = vst.msk [vmem:[#allocation2] sm:$0x3] %vm56_vm1, %v94_v22 }
  0xa0   :  { %v100_v23 = vld [vmem:[#allocation2] sm:$0x3] }
  0xa1   :  { %v101_v24 = vmul.f32 0.00390625, %v100_v23 }
  0xa3   :  { %187 = vmatmul.msk.f32.vlgmr.msra.gmra.mxu0 %vm104_vm4, %v101_v24 }
 0x120   :  { %v128_v26 = vpop.f32.mrf.mxu0 }
 0x121   :  { %v131_v27 = vadd.f32 %v128_v26, %v102_v25 }
 0x123   :  { %133 = vst.msk [vmem:[#allocation3] sm:$0x3] %vm51_vm2, %v131_v27 }
 0x12a   :  { %v136_v29 = vld [vmem:[#allocation3] sm:$0x3] }
 0x12b   :  { %v141_v30 = vadd.f32 %v194_v28, %v136_v29 }
 0x12d   :  { %v143_v31 = vsel %vm51_vm2, %v141_v30, -inf }
 0x12e   :  { %144 = vmax.xlane.f32.xlu1 %v143_v31 }
 0x1a1   :  { %v145_v32 = vpop.xlane.xlu1 %144 }
 0x1a2   :  { %v146_v33 = vsub.f32 %v141_v30, %v145_v32 }
 0x1a4   :  { %v147_v34 = vmul.f32 1.442695, %v146_v33 }
 0x1a6   :  { %195 = vpow2.f32 %v147_v34 }
 0x1ac   :  { %v196_v35 = vpop.eup %195 }
 0x1ad   :  { %v149_v36 = vsel %vm51_vm2, %v196_v35, 0.0 }
 0x1ae   :  { %150 = vadd.xlane.f32.xlu1 %v149_v36 }
 0x221   :  { %v151_v37 = vpop.xlane.xlu1 %150 }
 0x222   :  { %197 = vrcp.f32 %v151_v37  ;;  %v163_v41 = vand.u32 2147483648, %v151_v37  ;;  %v161_v43 = vand.u32 2147483647, %v151_v37  ;;  %vm157_vm6 = vweird.f32 %v151_v37 }
 0x224   :  { %v164_v45 = vor.u32 1.1754944e-38, %v163_v41  ;;  %vm162_vm8 = vcmp.eq.f32.partialorder %v161_v43, 8.507059e+37 }
 0x228   :  { %v198_v38 = vpop.eup %197 }
 0x229   :  { %v153_v39 = vmul.f32 %v198_v38, %v151_v37  ;;  %vm158_vm5 = vweird.f32 %v198_v38 }
 0x22a   :  { %vm159_vm7 = vmor %vm157_vm6, %vm158_vm5 }
 0x22b   :  { %v154_v40 = vsub.f32 1.0, %v153_v39 }
 0x22d   :  { %v155_v42 = vmul.f32 %v198_v38, %v154_v40 }
 0x22f   :  { %v156_v44 = vadd.f32 %v198_v38, %v155_v42 }
 0x231   :  { %v160_v46 = vsel %vm159_vm7, %v198_v38, %v156_v44 }
 0x232   :  { %v165_v47 = vsel %vm162_vm8, %v164_v45, %v160_v46 }
 0x233   :  { %v166_v48 = vmul.f32 %v196_v35, %v165_v47 }
 0x235   :  { %167 = vst.msk [vmem:[#allocation9] sm:$0x3] %vm51_vm2, %v166_v48 }
 0x236   :  { %178 = dma.vmem_to_hbm [thread:$0]  %s174_s24, 32, %s176_s27, [#allocation6]  }
 0x237   :  { %275 = dma.done.wait [#allocation6], 32  }
 0x238   :  { %276 = vsyncadd [#allocation6], 4294967264 }
 0x239   :  { %183 = vsyncpa [#allocation5], 1 }
 0x23a   :  { %184 = vsyncpa [#allocation8], 1 }
 0x23b   :  { %185 = vsyncpa [#allocation6], 1 }

</bundles_post_ra>
